<compile_context>
chip_gen: v7x
topology: tpu7x:2x2x1
jax: 0.10.0
libtpu: 0.0.40
codegen_flags: <defaults>
</compile_context>

<pallas_src>
import functools

import jax
import jax.numpy as jnp
import numpy as np
from jax.experimental import pallas as pl
from jax.experimental.pallas import tpu as pltpu

EPS = 1e-5
_VMEM_LIMIT = 32 * 1024 * 1024  # explicit scoped-VMEM limit (safe on v5e/v6e/v7x)


def _padded_geometry(H, W):
    """Flat padded-row geometry: interior starts at a 128-lane-aligned offset."""
    lpad = ((W + 1 + 127) // 128) * 128      # left pad (>= W+1, lane aligned)
    length = lpad + H * W + W + 1            # left pad + interior + right halo
    return lpad, length


def _pick_chunk_rows(H, W, max_lanes=1024):
    """Rows per in-kernel chunk: lane extent <= max_lanes, divides H evenly."""
    r = max(1, min(H, max_lanes // max(W, 1)))
    while H % r != 0:
        r -= 1
    return r


def _conv_bn_stats_kernel(x_ref, w_ref, sc_ref, sh_ref, y_ref, st_ref, p_ref,
                          *, H, W, chunk_rows, apply_input_affine, compute_dtype):
    """One image: (optional BN+ReLU on input) -> 3x3 conv -> raw output + stats.

    Layout: activations are (C, H*W)  [channels on sublanes, spatial on lanes].
    """
    cin = x_ref.shape[1]
    cout = y_ref.shape[1]
    HW = H * W
    lpad, _ = _padded_geometry(H, W)

    # ---- load this image; fuse previous layer's BN + ReLU if requested ----
    x = x_ref[0].astype(jnp.float32)                              # (cin, HW)
    if apply_input_affine:
        x = jnp.maximum(x * sc_ref[...] + sh_ref[...], 0.0)

    # ---- flat padded row buffer: zero ONLY the (W+1)-wide halos ----
    p_ref[:, lpad - (W + 1):lpad] = jnp.zeros((cin, W + 1), jnp.float32)
    p_ref[:, lpad + HW:lpad + HW + W + 1] = jnp.zeros((cin, W + 1), jnp.float32)
    p_ref[:, lpad:lpad + HW] = x                                  # aligned interior write

    w2d = w_ref[...]                                              # (cout, 9*cin), compute_dtype

    chw = chunk_rows * W
    wpos = jax.lax.broadcasted_iota(jnp.int32, (1, chw), 1) % W
    mask_l = wpos != 0           # left-neighbor tap invalid at w == 0
    mask_r = wpos != W - 1       # right-neighbor tap invalid at w == W-1

    s1 = jnp.zeros((cout, 1), jnp.float32)
    s2 = jnp.zeros((cout, 1), jnp.float32)

    for c in range(H // chunk_rows):
        base = lpad + c * chw
        taps = []
        for dy in (-1, 0, 1):
            for dx in (-1, 0, 1):
                t = p_ref[:, base + dy * W + dx: base + dy * W + dx + chw]
                if dx == -1:
                    t = jnp.where(mask_l, t, 0.0)
                elif dx == 1:
                    t = jnp.where(mask_r, t, 0.0)
                taps.append(t)
        # im2col: single MXU contraction with K = 9*cin, lane-dense output.
        patch = jnp.concatenate(taps, axis=0).astype(compute_dtype)   # (9*cin, chw)
        y = jnp.dot(w2d, patch, preferred_element_type=jnp.float32)   # (cout, chw)
        y_ref[0, :, c * chw:(c + 1) * chw] = y
        # single-pass BN statistics (lane reductions on the XLU)
        s1 = s1 + jnp.sum(y, axis=1, keepdims=True)
        s2 = s2 + jnp.sum(y * y, axis=1, keepdims=True)

    st_ref[0] = jnp.concatenate([s1, s2], axis=1)                 # (cout, 2)


def _bn_relu_kernel(y_ref, sc_ref, sh_ref, o_ref):
    o_ref[0] = jnp.maximum(y_ref[0] * sc_ref[...] + sh_ref[...], 0.0)


def _conv_layer(x_img, w2d, scale_in, shift_in, *, H, W, cout,
                apply_input_affine, compute_dtype, chunk_rows):
    """pallas_call wrapper for one conv (+optional fused input affine+ReLU) + stats."""
    N, cin, HW = x_img.shape
    _, length = _padded_geometry(H, W)
    kern = functools.partial(
        _conv_bn_stats_kernel, H=H, W=W, chunk_rows=chunk_rows,
        apply_input_affine=apply_input_affine, compute_dtype=compute_dtype)
    return pl.pallas_call(
        kern,
        out_shape=(jax.ShapeDtypeStruct((N, cout, HW), jnp.float32),
                   jax.ShapeDtypeStruct((N, cout, 2), jnp.float32)),
        grid=(N,),
        in_specs=[
            pl.BlockSpec((1, cin, HW), lambda n: (n, 0, 0)),      # one image / step
            pl.BlockSpec((cout, 9 * cin), lambda n: (0, 0)),      # weights (invariant)
            pl.BlockSpec((cin, 1), lambda n: (0, 0)),             # input BN scale
            pl.BlockSpec((cin, 1), lambda n: (0, 0)),             # input BN shift
        ],
        out_specs=(pl.BlockSpec((1, cout, HW), lambda n: (n, 0, 0)),
                   pl.BlockSpec((1, cout, 2), lambda n: (n, 0, 0))),
        scratch_shapes=[pltpu.VMEM((cin, length), jnp.float32)],  # small per-tile pad buf
        compiler_params=pltpu.CompilerParams(
            dimension_semantics=("parallel",),
            vmem_limit_bytes=_VMEM_LIMIT),
    )(x_img, w2d, scale_in, shift_in)


def _bn_scale_shift(stats, gamma, beta, count):
    """Fold train-mode BN (biased variance, eps=1e-5) into per-channel scale/shift."""
    s1 = jnp.sum(stats[:, :, 0], axis=0)
    s2 = jnp.sum(stats[:, :, 1], axis=0)
    mean = s1 / count
    var = s2 / count - mean * mean
    scale = gamma * jax.lax.rsqrt(var + EPS)
    shift = beta - mean * scale
    return (scale.reshape(-1, 1).astype(jnp.float32),
            shift.reshape(-1, 1).astype(jnp.float32))


def double_conv(x_nchw, params, *, compute_dtype=jnp.float32):
    """Forward pass of DoubleConv. x_nchw: (N, Cin, H, W) f32 -> (N, Cout, H, W) f32."""
    N, Cin, H, W = x_nchw.shape
    Cout = params["w1"].shape[-1]
    HW = H * W
    chunk_rows = _pick_chunk_rows(H, W)

    x = x_nchw.reshape(N, Cin, HW)                       # free reshape (stays NCHW order)
    # HWIO -> (Cout, 9*Cin), tap-major, matching the in-kernel patch ordering.
    # Pre-cast to the MXU compute dtype so there is no per-grid-step cast of a
    # grid-invariant operand inside the kernel.
    w1 = (jnp.transpose(params["w1"], (3, 0, 1, 2))
          .reshape(Cout, 9 * Cin).astype(compute_dtype))
    w2 = (jnp.transpose(params["w2"], (3, 0, 1, 2))
          .reshape(Cout, 9 * Cout).astype(compute_dtype))
    # NOTE: conv biases b1/b2 are intentionally dropped — they cancel exactly under
    # train-mode BatchNorm (the batch mean absorbs any per-channel shift).

    one = jnp.ones((Cin, 1), jnp.float32)
    zero = jnp.zeros((Cin, 1), jnp.float32)

    # layer 1: conv1 + partial BN stats
    y1, st1 = _conv_layer(x, w1, one, zero, H=H, W=W, cout=Cout,
                          apply_input_affine=False, compute_dtype=compute_dtype,
                          chunk_rows=chunk_rows)
    sc1, sh1 = _bn_scale_shift(st1, params["g1"], params["be1"], N * HW)

    # layer 2: (BN1 + ReLU fused on load) -> conv2 + partial BN stats
    y2, st2 = _conv_layer(y1, w2, sc1, sh1, H=H, W=W, cout=Cout,
                          apply_input_affine=True, compute_dtype=compute_dtype,
                          chunk_rows=chunk_rows)
    sc2, sh2 = _bn_scale_shift(st2, params["g2"], params["be2"], N * HW)

    # final BN2 + ReLU (lane-dense elementwise kernel)
    out = pl.pallas_call(
        _bn_relu_kernel,
        out_shape=jax.ShapeDtypeStruct((N, Cout, HW), jnp.float32),
        grid=(N,),
        in_specs=[pl.BlockSpec((1, Cout, HW), lambda n: (n, 0, 0)),
                  pl.BlockSpec((Cout, 1), lambda n: (0, 0)),
                  pl.BlockSpec((Cout, 1), lambda n: (0, 0))],
        out_specs=pl.BlockSpec((1, Cout, HW), lambda n: (n, 0, 0)),
        compiler_params=pltpu.CompilerParams(
            dimension_semantics=("parallel",),
            vmem_limit_bytes=_VMEM_LIMIT),
    )(y2, sc2, sh2)

    return out.reshape(N, Cout, H, W)


def ref_double_conv(x, p):
    """Pure-JAX reference (matches PyTorch DoubleConv forward in train mode)."""
    def conv(x, w, b):  # w is HWIO
        y = jax.lax.conv_general_dilated(
            x, w, window_strides=(1, 1), padding="SAME",
            dimension_numbers=("NCHW", "HWIO", "NCHW"),
            precision=jax.lax.Precision.HIGHEST)
        return y + b[None, :, None, None]

    def bn(x, g, be):
        mean = x.mean(axis=(0, 2, 3), keepdims=True)
        var = ((x - mean) ** 2).mean(axis=(0, 2, 3), keepdims=True)
        xn = (x - mean) * jax.lax.rsqrt(var + EPS)
        return xn * g[None, :, None, None] + be[None, :, None, None]

    h = jnp.maximum(bn(conv(x, p["w1"], p["b1"]), p["g1"], p["be1"]), 0.0)
    return jnp.maximum(bn(conv(h, p["w2"], p["b2"]), p["g2"], p["be2"]), 0.0)


def init_params(key, in_ch, out_ch):
    """Deterministic synthetic parameters (HWIO conv weights, BN gamma=1 beta=0)."""
    k1, k2, k3, k4 = jax.random.split(key, 4)
    return {
        "w1": jax.random.normal(k1, (3, 3, in_ch, out_ch), jnp.float32) * 0.1,
        "b1": jax.random.normal(k2, (out_ch,), jnp.float32) * 0.05,
        "g1": jnp.ones((out_ch,), jnp.float32),
        "be1": jnp.zeros((out_ch,), jnp.float32),
        "w2": jax.random.normal(k3, (3, 3, out_ch, out_ch), jnp.float32) * 0.1,
        "b2": jax.random.normal(k4, (out_ch,), jnp.float32) * 0.05,
        "g2": jnp.ones((out_ch,), jnp.float32),
        "be2": jnp.zeros((out_ch,), jnp.float32),
    }


if __name__ == "__main__":
    key = jax.random.PRNGKey(0)
    kx, kp = jax.random.split(key)

    N, Cin, Cout, H, W = 2, 4, 8, 16, 16
    x = jax.random.normal(kx, (N, Cin, H, W), jnp.float32)
    params = init_params(kp, Cin, Cout)

    ref = jax.block_until_ready(ref_double_conv(x, params))

    # Whole forward under one jit: three pallas_calls + BN-fold math dispatch once.
    fwd = jax.jit(double_conv, static_argnames="compute_dtype")

    # f32 MXU operands: tight check against the PyTorch-semantics reference.
    out = jax.block_until_ready(fwd(x, params, compute_dtype=jnp.float32))
    np.testing.assert_allclose(np.asarray(out), np.asarray(ref), rtol=2e-4, atol=2e-4)

    # bf16 MXU operands (recommended on v6e/v7x), f32 accumulation/stats: looser check.
    out_bf16 = jax.block_until_ready(fwd(x, params, compute_dtype=jnp.bfloat16))
    np.testing.assert_allclose(np.asarray(out_bf16), np.asarray(ref), rtol=1e-1, atol=1e-1)

    print("KERNEL_OK")
</pallas_src>

<mosaic_0001>
module attributes {stable_mosaic.version = 11 : i64} {
  func.func @_conv_bn_stats_kernel(%arg0: i32, %arg1: memref<1x4x256xf32, #tpu.memory_space<vmem>>, %arg2: memref<8x36xf32, #tpu.memory_space<vmem>>, %arg3: memref<4x1xf32, #tpu.memory_space<vmem>>, %arg4: memref<4x1xf32, #tpu.memory_space<vmem>>, %arg5: memref<1x8x256xf32, #tpu.memory_space<vmem>>, %arg6: memref<1x8x2xf32, #tpu.memory_space<vmem>>, %arg7: memref<4x401xf32, #tpu.memory_space<vmem>>) attributes {dimension_semantics = [#tpu.dimension_semantics<parallel>], iteration_bounds = array<i64: 2>, scalar_prefetch = 0 : i64, scratch_operands = 1 : i64, tpu.core_type = #tpu.core_type<tc>, window_params = [{transform_indices = @transform_0, window_bounds = array<i64: 1, 4, 256>}, {pipeline_mode = #tpu.pipeline_mode<synchronous>, transform_indices = @transform_1, window_bounds = array<i64: 8, 36>}, {pipeline_mode = #tpu.pipeline_mode<synchronous>, transform_indices = @transform_2, window_bounds = array<i64: 4, 1>}, {pipeline_mode = #tpu.pipeline_mode<synchronous>, transform_indices = @transform_3, window_bounds = array<i64: 4, 1>}, {transform_indices = @transform_4, window_bounds = array<i64: 1, 8, 256>}, {transform_indices = @transform_5, window_bounds = array<i64: 1, 8, 2>}]} {
    %c0 = arith.constant 0 : index
    %c0_0 = arith.constant 0 : index
    %c0_1 = arith.constant 0 : index
    %0 = vector.load %arg1[%c0, %c0_0, %c0_1] : memref<1x4x256xf32, #tpu.memory_space<vmem>>, vector<1x4x256xf32>
    %1 = vector.shape_cast %0 : vector<1x4x256xf32> to vector<4x256xf32>
    %cst = arith.constant 0.000000e+00 : f32
    %2 = vector.broadcast %cst : f32 to vector<4x17xf32>
    %c0_2 = arith.constant 0 : index
    %c111 = arith.constant 111 : index
    %3 = vector.load %arg7[%c0_2, %c111] : memref<4x401xf32, #tpu.memory_space<vmem>>, vector<4x17xf32>
    tpu.vector_store %arg7[%c0_2, %c111], %2 {strides = array<i32>} : memref<4x401xf32, #tpu.memory_space<vmem>>, vector<4x17xf32>,
    %cst_3 = arith.constant 0.000000e+00 : f32
    %4 = vector.broadcast %cst_3 : f32 to vector<4x17xf32>
    %c0_4 = arith.constant 0 : index
    %c384 = arith.constant 384 : index
    %5 = vector.load %arg7[%c0_4, %c384] : memref<4x401xf32, #tpu.memory_space<vmem>>, vector<4x17xf32>
    tpu.vector_store %arg7[%c0_4, %c384], %4 {strides = array<i32>} : memref<4x401xf32, #tpu.memory_space<vmem>>, vector<4x17xf32>,
    %c0_5 = arith.constant 0 : index
    %c128 = arith.constant 128 : index
    %6 = vector.load %arg7[%c0_5, %c128] : memref<4x401xf32, #tpu.memory_space<vmem>>, vector<4x256xf32>
    tpu.vector_store %arg7[%c0_5, %c128], %1 {strides = array<i32>} : memref<4x401xf32, #tpu.memory_space<vmem>>, vector<4x256xf32>,
    %c0_6 = arith.constant 0 : index
    %c0_7 = arith.constant 0 : index
    %7 = vector.load %arg2[%c0_6, %c0_7] : memref<8x36xf32, #tpu.memory_space<vmem>>, vector<8x36xf32>
    %8 = tpu.iota {dimensions = array<i32: 1>} : vector<1x256xi32>
    %c16_i32 = arith.constant 16 : i32
    %c0_i32 = arith.constant 0 : i32
    %9 = arith.cmpi eq, %c16_i32, %c0_i32 : i32
    %c1_i32 = arith.constant 1 : i32
    %10 = arith.select %9, %c1_i32, %c16_i32 : i32
    %11 = vector.broadcast %10 : i32 to vector<1x256xi32>
    %12 = arith.remsi %8, %11 : vector<1x256xi32>
    %c0_i32_8 = arith.constant 0 : i32
    %13 = vector.broadcast %c0_i32_8 : i32 to vector<1x256xi32>
    %14 = arith.cmpi ne, %12, %13 : vector<1x256xi32>
    %c0_i32_9 = arith.constant 0 : i32
    %15 = vector.broadcast %c0_i32_9 : i32 to vector<1x256xi32>
    %16 = arith.cmpi slt, %12, %15 : vector<1x256xi32>
    %c0_i32_10 = arith.constant 0 : i32
    %17 = arith.cmpi slt, %10, %c0_i32_10 : i32
    %18 = vector.broadcast %17 : i1 to vector<1x256xi1>
    %19 = vector.broadcast %18 : vector<1x256xi1> to vector<1x256xi1>
    %20 = arith.xori %16, %19 : vector<1x256xi1>
    %21 = arith.andi %20, %14 : vector<1x256xi1>
    %22 = vector.broadcast %10 : i32 to vector<1x256xi32>
    %23 = arith.addi %12, %22 : vector<1x256xi32>
    %24 = arith.select %21, %23, %12 : vector<1x256xi1>, vector<1x256xi32>
    %c0_i32_11 = arith.constant 0 : i32
    %25 = vector.broadcast %c0_i32_11 : i32 to vector<1x256xi32>
    %26 = arith.cmpi ne, %24, %25 : vector<1x256xi32>
    %c15_i32 = arith.constant 15 : i32
    %27 = vector.broadcast %c15_i32 : i32 to vector<1x256xi32>
    %28 = arith.cmpi ne, %24, %27 : vector<1x256xi32>
    %cst_12 = arith.constant 0.000000e+00 : f32
    %29 = vector.broadcast %cst_12 : f32 to vector<8x1xf32>
    %cst_13 = arith.constant 0.000000e+00 : f32
    %30 = vector.broadcast %cst_13 : f32 to vector<8x1xf32>
    %c0_14 = arith.constant 0 : index
    %c111_15 = arith.constant 111 : index
    %31 = vector.load %arg7[%c0_14, %c111_15] : memref<4x401xf32, #tpu.memory_space<vmem>>, vector<4x256xf32>
    %cst_16 = arith.constant 0.000000e+00 : f32
    %32 = vector.shape_cast %26 : vector<1x256xi1> to vector<1x256xi1>
    %33 = vector.broadcast %32 : vector<1x256xi1> to vector<4x256xi1>
    %34 = vector.broadcast %cst_16 : f32 to vector<4x256xf32>
    %35 = arith.select %33, %31, %34 : vector<4x256xi1>, vector<4x256xf32>
    %c0_17 = arith.constant 0 : index
    %c112 = arith.constant 112 : index
    %36 = vector.load %arg7[%c0_17, %c112] : memref<4x401xf32, #tpu.memory_space<vmem>>, vector<4x256xf32>
    %c0_18 = arith.constant 0 : index
    %c113 = arith.constant 113 : index
    %37 = vector.load %arg7[%c0_18, %c113] : memref<4x401xf32, #tpu.memory_space<vmem>>, vector<4x256xf32>
    %cst_19 = arith.constant 0.000000e+00 : f32
    %38 = vector.shape_cast %28 : vector<1x256xi1> to vector<1x256xi1>
    %39 = vector.broadcast %38 : vector<1x256xi1> to vector<4x256xi1>
    %40 = vector.broadcast %cst_19 : f32 to vector<4x256xf32>
    %41 = arith.select %39, %37, %40 : vector<4x256xi1>, vector<4x256xf32>
    %c0_20 = arith.constant 0 : index
    %c127 = arith.constant 127 : index
    %42 = vector.load %arg7[%c0_20, %c127] : memref<4x401xf32, #tpu.memory_space<vmem>>, vector<4x256xf32>
    %cst_21 = arith.constant 0.000000e+00 : f32
    %43 = vector.shape_cast %26 : vector<1x256xi1> to vector<1x256xi1>
    %44 = vector.broadcast %43 : vector<1x256xi1> to vector<4x256xi1>
    %45 = vector.broadcast %cst_21 : f32 to vector<4x256xf32>
    %46 = arith.select %44, %42, %45 : vector<4x256xi1>, vector<4x256xf32>
    %c0_22 = arith.constant 0 : index
    %c128_23 = arith.constant 128 : index
    %47 = vector.load %arg7[%c0_22, %c128_23] : memref<4x401xf32, #tpu.memory_space<vmem>>, vector<4x256xf32>
    %c0_24 = arith.constant 0 : index
    %c129 = arith.constant 129 : index
    %48 = vector.load %arg7[%c0_24, %c129] : memref<4x401xf32, #tpu.memory_space<vmem>>, vector<4x256xf32>
    %cst_25 = arith.constant 0.000000e+00 : f32
    %49 = vector.shape_cast %28 : vector<1x256xi1> to vector<1x256xi1>
    %50 = vector.broadcast %49 : vector<1x256xi1> to vector<4x256xi1>
    %51 = vector.broadcast %cst_25 : f32 to vector<4x256xf32>
    %52 = arith.select %50, %48, %51 : vector<4x256xi1>, vector<4x256xf32>
    %c0_26 = arith.constant 0 : index
    %c143 = arith.constant 143 : index
    %53 = vector.load %arg7[%c0_26, %c143] : memref<4x401xf32, #tpu.memory_space<vmem>>, vector<4x256xf32>
    %cst_27 = arith.constant 0.000000e+00 : f32
    %54 = vector.shape_cast %26 : vector<1x256xi1> to vector<1x256xi1>
    %55 = vector.broadcast %54 : vector<1x256xi1> to vector<4x256xi1>
    %56 = vector.broadcast %cst_27 : f32 to vector<4x256xf32>
    %57 = arith.select %55, %53, %56 : vector<4x256xi1>, vector<4x256xf32>
    %c0_28 = arith.constant 0 : index
    %c144 = arith.constant 144 : index
    %58 = vector.load %arg7[%c0_28, %c144] : memref<4x401xf32, #tpu.memory_space<vmem>>, vector<4x256xf32>
    %c0_29 = arith.constant 0 : index
    %c145 = arith.constant 145 : index
    %59 = vector.load %arg7[%c0_29, %c145] : memref<4x401xf32, #tpu.memory_space<vmem>>, vector<4x256xf32>
    %cst_30 = arith.constant 0.000000e+00 : f32
    %60 = vector.shape_cast %28 : vector<1x256xi1> to vector<1x256xi1>
    %61 = vector.broadcast %60 : vector<1x256xi1> to vector<4x256xi1>
    %62 = vector.broadcast %cst_30 : f32 to vector<4x256xf32>
    %63 = arith.select %61, %59, %62 : vector<4x256xi1>, vector<4x256xf32>
    %64 = tpu.concatenate %35, %36, %41, %46, %47, %52, %57, %58, %63 in 0 : vector<4x256xf32>, vector<4x256xf32>, vector<4x256xf32>, vector<4x256xf32>, vector<4x256xf32>, vector<4x256xf32>, vector<4x256xf32>, vector<4x256xf32>, vector<4x256xf32> -> vector<36x256xf32>
    %cst_31 = arith.constant dense<0.000000e+00> : vector<8x256xf32>
    %65 = tpu.matmul %7, %64, %cst_31 {dimension_numbers = #tpu.dot_dimension_numbers<[1], [0], [0], [1], [0, 0, 1, 1], [], []>} : vector<8x36xf32>, vector<36x256xf32>, vector<8x256xf32> -> vector<8x256xf32>
    %c0_32 = arith.constant 0 : index
    %c0_33 = arith.constant 0 : index
    %c0_34 = arith.constant 0 : index
    %66 = vector.load %arg5[%c0_32, %c0_33, %c0_34] : memref<1x8x256xf32, #tpu.memory_space<vmem>>, vector<1x8x256xf32>
    %67 = vector.shape_cast %66 : vector<1x8x256xf32> to vector<8x256xf32>
    %68 = vector.shape_cast %65 : vector<8x256xf32> to vector<1x8x256xf32>
    tpu.vector_store %arg5[%c0_32, %c0_33, %c0_34], %68 {strides = array<i32>} : memref<1x8x256xf32, #tpu.memory_space<vmem>>, vector<1x8x256xf32>,
    %cst_35 = arith.constant dense<0.000000e+00> : vector<8xf32>
    %69 = vector.multi_reduction <add>, %65, %cst_35 [1] : vector<8x256xf32> to vector<8xf32>
    %70 = vector.shape_cast %69 : vector<8xf32> to vector<8x1xf32>
    %71 = arith.addf %29, %70 : vector<8x1xf32>
    %72 = arith.mulf %65, %65 : vector<8x256xf32>
    %cst_36 = arith.constant dense<0.000000e+00> : vector<8xf32>
    %73 = vector.multi_reduction <add>, %72, %cst_36 [1] : vector<8x256xf32> to vector<8xf32>
    %74 = vector.shape_cast %73 : vector<8xf32> to vector<8x1xf32>
    %75 = arith.addf %30, %74 : vector<8x1xf32>
    %76 = tpu.concatenate %71, %75 in 1 : vector<8x1xf32>, vector<8x1xf32> -> vector<8x2xf32>
    %c0_37 = arith.constant 0 : index
    %c0_38 = arith.constant 0 : index
    %c0_39 = arith.constant 0 : index
    %77 = vector.load %arg6[%c0_37, %c0_38, %c0_39] : memref<1x8x2xf32, #tpu.memory_space<vmem>>, vector<1x8x2xf32>
    %78 = vector.shape_cast %77 : vector<1x8x2xf32> to vector<8x2xf32>
    %79 = vector.shape_cast %76 : vector<8x2xf32> to vector<1x8x2xf32>
    tpu.vector_store %arg6[%c0_37, %c0_38, %c0_39], %79 {strides = array<i32>} : memref<1x8x2xf32, #tpu.memory_space<vmem>>, vector<1x8x2xf32>,
    return
  }
  func.func @transform_0(%arg0: i32) -> (i32, i32, i32) {
    %c0_i32 = arith.constant 0 : i32
    %c0_i32_0 = arith.constant 0 : i32
    %c0_i32_1 = arith.constant 0 : i32
    return %arg0, %c0_i32, %c0_i32_0 : i32, i32, i32
  }
  func.func @transform_1(%arg0: i32) -> (i32, i32) {
    %c0_i32 = arith.constant 0 : i32
    %c0_i32_0 = arith.constant 0 : i32
    %c0_i32_1 = arith.constant 0 : i32
    return %c0_i32, %c0_i32_0 : i32, i32
  }
  func.func @transform_2(%arg0: i32) -> (i32, i32) {
    %c0_i32 = arith.constant 0 : i32
    %c0_i32_0 = arith.constant 0 : i32
    %c0_i32_1 = arith.constant 0 : i32
    return %c0_i32, %c0_i32_0 : i32, i32
  }
  func.func @transform_3(%arg0: i32) -> (i32, i32) {
    %c0_i32 = arith.constant 0 : i32
    %c0_i32_0 = arith.constant 0 : i32
    %c0_i32_1 = arith.constant 0 : i32
    return %c0_i32, %c0_i32_0 : i32, i32
  }
  func.func @transform_4(%arg0: i32) -> (i32, i32, i32) {
    %c0_i32 = arith.constant 0 : i32
    %c0_i32_0 = arith.constant 0 : i32
    %c0_i32_1 = arith.constant 0 : i32
    return %arg0, %c0_i32, %c0_i32_0 : i32, i32, i32
  }
  func.func @transform_5(%arg0: i32) -> (i32, i32, i32) {
    %c0_i32 = arith.constant 0 : i32
    %c0_i32_0 = arith.constant 0 : i32
    %c0_i32_1 = arith.constant 0 : i32
    return %arg0, %c0_i32, %c0_i32_0 : i32, i32, i32
  }
}

module attributes {stable_mosaic.version = 11 : i64} {
  func.func @_bn_relu_kernel(%arg0: i32, %arg1: memref<1x8x256xf32, #tpu.memory_space<vmem>>, %arg2: memref<8x1xf32, #tpu.memory_space<vmem>>, %arg3: memref<8x1xf32, #tpu.memory_space<vmem>>, %arg4: memref<1x8x256xf32, #tpu.memory_space<vmem>>) attributes {dimension_semantics = [#tpu.dimension_semantics<parallel>], iteration_bounds = array<i64: 2>, scalar_prefetch = 0 : i64, scratch_operands = 0 : i64, tpu.core_type = #tpu.core_type<tc>, window_params = [{transform_indices = @transform_0, window_bounds = array<i64: 1, 8, 256>}, {pipeline_mode = #tpu.pipeline_mode<synchronous>, transform_indices = @transform_1, window_bounds = array<i64: 8, 1>}, {pipeline_mode = #tpu.pipeline_mode<synchronous>, transform_indices = @transform_2, window_bounds = array<i64: 8, 1>}, {transform_indices = @transform_3, window_bounds = array<i64: 1, 8, 256>}]} {
    %c0 = arith.constant 0 : index
    %c0_0 = arith.constant 0 : index
    %c0_1 = arith.constant 0 : index
    %0 = vector.load %arg1[%c0, %c0_0, %c0_1] : memref<1x8x256xf32, #tpu.memory_space<vmem>>, vector<1x8x256xf32>
    %1 = vector.shape_cast %0 : vector<1x8x256xf32> to vector<8x256xf32>
    %c0_2 = arith.constant 0 : index
    %c0_3 = arith.constant 0 : index
    %2 = vector.load %arg2[%c0_2, %c0_3] : memref<8x1xf32, #tpu.memory_space<vmem>>, vector<8x1xf32>
    %3 = vector.broadcast %2 : vector<8x1xf32> to vector<8x256xf32>
    %4 = arith.mulf %1, %3 : vector<8x256xf32>
    %c0_4 = arith.constant 0 : index
    %c0_5 = arith.constant 0 : index
    %5 = vector.load %arg3[%c0_4, %c0_5] : memref<8x1xf32, #tpu.memory_space<vmem>>, vector<8x1xf32>
    %6 = vector.broadcast %5 : vector<8x1xf32> to vector<8x256xf32>
    %7 = arith.addf %4, %6 : vector<8x256xf32>
    %cst = arith.constant 0.000000e+00 : f32
    %8 = vector.broadcast %cst : f32 to vector<8x256xf32>
    %9 = arith.maximumf %7, %8 : vector<8x256xf32>
    %c0_6 = arith.constant 0 : index
    %c0_7 = arith.constant 0 : index
    %c0_8 = arith.constant 0 : index
    %10 = vector.load %arg4[%c0_6, %c0_7, %c0_8] : memref<1x8x256xf32, #tpu.memory_space<vmem>>, vector<1x8x256xf32>
    %11 = vector.shape_cast %10 : vector<1x8x256xf32> to vector<8x256xf32>
    %12 = vector.shape_cast %9 : vector<8x256xf32> to vector<1x8x256xf32>
    tpu.vector_store %arg4[%c0_6, %c0_7, %c0_8], %12 {strides = array<i32>} : memref<1x8x256xf32, #tpu.memory_space<vmem>>, vector<1x8x256xf32>,
    return
  }
  func.func @transform_0(%arg0: i32) -> (i32, i32, i32) {
    %c0_i32 = arith.constant 0 : i32
    %c0_i32_0 = arith.constant 0 : i32
    %c0_i32_1 = arith.constant 0 : i32
    return %arg0, %c0_i32, %c0_i32_0 : i32, i32, i32
  }
  func.func @transform_1(%arg0: i32) -> (i32, i32) {
    %c0_i32 = arith.constant 0 : i32
    %c0_i32_0 = arith.constant 0 : i32
    %c0_i32_1 = arith.constant 0 : i32
    return %c0_i32, %c0_i32_0 : i32, i32
  }
  func.func @transform_2(%arg0: i32) -> (i32, i32) {
    %c0_i32 = arith.constant 0 : i32
    %c0_i32_0 = arith.constant 0 : i32
    %c0_i32_1 = arith.constant 0 : i32
    return %c0_i32, %c0_i32_0 : i32, i32
  }
  func.func @transform_3(%arg0: i32) -> (i32, i32, i32) {
    %c0_i32 = arith.constant 0 : i32
    %c0_i32_0 = arith.constant 0 : i32
    %c0_i32_1 = arith.constant 0 : i32
    return %arg0, %c0_i32, %c0_i32_0 : i32, i32, i32
  }
}

module attributes {stable_mosaic.version = 11 : i64} {
  func.func @_conv_bn_stats_kernel(%arg0: i32, %arg1: memref<1x8x256xf32, #tpu.memory_space<vmem>>, %arg2: memref<8x72xf32, #tpu.memory_space<vmem>>, %arg3: memref<8x1xf32, #tpu.memory_space<vmem>>, %arg4: memref<8x1xf32, #tpu.memory_space<vmem>>, %arg5: memref<1x8x256xf32, #tpu.memory_space<vmem>>, %arg6: memref<1x8x2xf32, #tpu.memory_space<vmem>>, %arg7: memref<8x401xf32, #tpu.memory_space<vmem>>) attributes {dimension_semantics = [#tpu.dimension_semantics<parallel>], iteration_bounds = array<i64: 2>, scalar_prefetch = 0 : i64, scratch_operands = 1 : i64, tpu.core_type = #tpu.core_type<tc>, window_params = [{transform_indices = @transform_0, window_bounds = array<i64: 1, 8, 256>}, {pipeline_mode = #tpu.pipeline_mode<synchronous>, transform_indices = @transform_1, window_bounds = array<i64: 8, 72>}, {pipeline_mode = #tpu.pipeline_mode<synchronous>, transform_indices = @transform_2, window_bounds = array<i64: 8, 1>}, {pipeline_mode = #tpu.pipeline_mode<synchronous>, transform_indices = @transform_3, window_bounds = array<i64: 8, 1>}, {transform_indices = @transform_4, window_bounds = array<i64: 1, 8, 256>}, {transform_indices = @transform_5, window_bounds = array<i64: 1, 8, 2>}]} {
    %c0 = arith.constant 0 : index
    %c0_0 = arith.constant 0 : index
    %c0_1 = arith.constant 0 : index
    %0 = vector.load %arg1[%c0, %c0_0, %c0_1] : memref<1x8x256xf32, #tpu.memory_space<vmem>>, vector<1x8x256xf32>
    %1 = vector.shape_cast %0 : vector<1x8x256xf32> to vector<8x256xf32>
    %c0_2 = arith.constant 0 : index
    %c0_3 = arith.constant 0 : index
    %2 = vector.load %arg3[%c0_2, %c0_3] : memref<8x1xf32, #tpu.memory_space<vmem>>, vector<8x1xf32>
    %3 = vector.broadcast %2 : vector<8x1xf32> to vector<8x256xf32>
    %4 = arith.mulf %1, %3 : vector<8x256xf32>
    %c0_4 = arith.constant 0 : index
    %c0_5 = arith.constant 0 : index
    %5 = vector.load %arg4[%c0_4, %c0_5] : memref<8x1xf32, #tpu.memory_space<vmem>>, vector<8x1xf32>
    %6 = vector.broadcast %5 : vector<8x1xf32> to vector<8x256xf32>
    %7 = arith.addf %4, %6 : vector<8x256xf32>
    %cst = arith.constant 0.000000e+00 : f32
    %8 = vector.broadcast %cst : f32 to vector<8x256xf32>
    %9 = arith.maximumf %7, %8 : vector<8x256xf32>
    %cst_6 = arith.constant 0.000000e+00 : f32
    %10 = vector.broadcast %cst_6 : f32 to vector<8x17xf32>
    %c0_7 = arith.constant 0 : index
    %c111 = arith.constant 111 : index
    %11 = vector.load %arg7[%c0_7, %c111] : memref<8x401xf32, #tpu.memory_space<vmem>>, vector<8x17xf32>
    tpu.vector_store %arg7[%c0_7, %c111], %10 {strides = array<i32>} : memref<8x401xf32, #tpu.memory_space<vmem>>, vector<8x17xf32>,
    %cst_8 = arith.constant 0.000000e+00 : f32
    %12 = vector.broadcast %cst_8 : f32 to vector<8x17xf32>
    %c0_9 = arith.constant 0 : index
    %c384 = arith.constant 384 : index
    %13 = vector.load %arg7[%c0_9, %c384] : memref<8x401xf32, #tpu.memory_space<vmem>>, vector<8x17xf32>
    tpu.vector_store %arg7[%c0_9, %c384], %12 {strides = array<i32>} : memref<8x401xf32, #tpu.memory_space<vmem>>, vector<8x17xf32>,
    %c0_10 = arith.constant 0 : index
    %c128 = arith.constant 128 : index
    %14 = vector.load %arg7[%c0_10, %c128] : memref<8x401xf32, #tpu.memory_space<vmem>>, vector<8x256xf32>
    tpu.vector_store %arg7[%c0_10, %c128], %9 {strides = array<i32>} : memref<8x401xf32, #tpu.memory_space<vmem>>, vector<8x256xf32>,
    %c0_11 = arith.constant 0 : index
    %c0_12 = arith.constant 0 : index
    %15 = vector.load %arg2[%c0_11, %c0_12] : memref<8x72xf32, #tpu.memory_space<vmem>>, vector<8x72xf32>
    %16 = tpu.iota {dimensions = array<i32: 1>} : vector<1x256xi32>
    %c16_i32 = arith.constant 16 : i32
    %c0_i32 = arith.constant 0 : i32
    %17 = arith.cmpi eq, %c16_i32, %c0_i32 : i32
    %c1_i32 = arith.constant 1 : i32
    %18 = arith.select %17, %c1_i32, %c16_i32 : i32
    %19 = vector.broadcast %18 : i32 to vector<1x256xi32>
    %20 = arith.remsi %16, %19 : vector<1x256xi32>
    %c0_i32_13 = arith.constant 0 : i32
    %21 = vector.broadcast %c0_i32_13 : i32 to vector<1x256xi32>
    %22 = arith.cmpi ne, %20, %21 : vector<1x256xi32>
    %c0_i32_14 = arith.constant 0 : i32
    %23 = vector.broadcast %c0_i32_14 : i32 to vector<1x256xi32>
    %24 = arith.cmpi slt, %20, %23 : vector<1x256xi32>
    %c0_i32_15 = arith.constant 0 : i32
    %25 = arith.cmpi slt, %18, %c0_i32_15 : i32
    %26 = vector.broadcast %25 : i1 to vector<1x256xi1>
    %27 = vector.broadcast %26 : vector<1x256xi1> to vector<1x256xi1>
    %28 = arith.xori %24, %27 : vector<1x256xi1>
    %29 = arith.andi %28, %22 : vector<1x256xi1>
    %30 = vector.broadcast %18 : i32 to vector<1x256xi32>
    %31 = arith.addi %20, %30 : vector<1x256xi32>
    %32 = arith.select %29, %31, %20 : vector<1x256xi1>, vector<1x256xi32>
    %c0_i32_16 = arith.constant 0 : i32
    %33 = vector.broadcast %c0_i32_16 : i32 to vector<1x256xi32>
    %34 = arith.cmpi ne, %32, %33 : vector<1x256xi32>
    %c15_i32 = arith.constant 15 : i32
    %35 = vector.broadcast %c15_i32 : i32 to vector<1x256xi32>
    %36 = arith.cmpi ne, %32, %35 : vector<1x256xi32>
    %cst_17 = arith.constant 0.000000e+00 : f32
    %37 = vector.broadcast %cst_17 : f32 to vector<8x1xf32>
    %cst_18 = arith.constant 0.000000e+00 : f32
    %38 = vector.broadcast %cst_18 : f32 to vector<8x1xf32>
    %c0_19 = arith.constant 0 : index
    %c111_20 = arith.constant 111 : index
    %39 = vector.load %arg7[%c0_19, %c111_20] : memref<8x401xf32, #tpu.memory_space<vmem>>, vector<8x256xf32>
    %cst_21 = arith.constant 0.000000e+00 : f32
    %40 = vector.shape_cast %34 : vector<1x256xi1> to vector<1x256xi1>
    %41 = vector.broadcast %40 : vector<1x256xi1> to vector<8x256xi1>
    %42 = vector.broadcast %cst_21 : f32 to vector<8x256xf32>
    %43 = arith.select %41, %39, %42 : vector<8x256xi1>, vector<8x256xf32>
    %c0_22 = arith.constant 0 : index
    %c112 = arith.constant 112 : index
    %44 = vector.load %arg7[%c0_22, %c112] : memref<8x401xf32, #tpu.memory_space<vmem>>, vector<8x256xf32>
    %c0_23 = arith.constant 0 : index
    %c113 = arith.constant 113 : index
    %45 = vector.load %arg7[%c0_23, %c113] : memref<8x401xf32, #tpu.memory_space<vmem>>, vector<8x256xf32>
    %cst_24 = arith.constant 0.000000e+00 : f32
    %46 = vector.shape_cast %36 : vector<1x256xi1> to vector<1x256xi1>
    %47 = vector.broadcast %46 : vector<1x256xi1> to vector<8x256xi1>
    %48 = vector.broadcast %cst_24 : f32 to vector<8x256xf32>
    %49 = arith.select %47, %45, %48 : vector<8x256xi1>, vector<8x256xf32>
    %c0_25 = arith.constant 0 : index
    %c127 = arith.constant 127 : index
    %50 = vector.load %arg7[%c0_25, %c127] : memref<8x401xf32, #tpu.memory_space<vmem>>, vector<8x256xf32>
    %cst_26 = arith.constant 0.000000e+00 : f32
    %51 = vector.shape_cast %34 : vector<1x256xi1> to vector<1x256xi1>
    %52 = vector.broadcast %51 : vector<1x256xi1> to vector<8x256xi1>
    %53 = vector.broadcast %cst_26 : f32 to vector<8x256xf32>
    %54 = arith.select %52, %50, %53 : vector<8x256xi1>, vector<8x256xf32>
    %c0_27 = arith.constant 0 : index
    %c128_28 = arith.constant 128 : index
    %55 = vector.load %arg7[%c0_27, %c128_28] : memref<8x401xf32, #tpu.memory_space<vmem>>, vector<8x256xf32>
    %c0_29 = arith.constant 0 : index
    %c129 = arith.constant 129 : index
    %56 = vector.load %arg7[%c0_29, %c129] : memref<8x401xf32, #tpu.memory_space<vmem>>, vector<8x256xf32>
    %cst_30 = arith.constant 0.000000e+00 : f32
    %57 = vector.shape_cast %36 : vector<1x256xi1> to vector<1x256xi1>
    %58 = vector.broadcast %57 : vector<1x256xi1> to vector<8x256xi1>
    %59 = vector.broadcast %cst_30 : f32 to vector<8x256xf32>
    %60 = arith.select %58, %56, %59 : vector<8x256xi1>, vector<8x256xf32>
    %c0_31 = arith.constant 0 : index
    %c143 = arith.constant 143 : index
    %61 = vector.load %arg7[%c0_31, %c143] : memref<8x401xf32, #tpu.memory_space<vmem>>, vector<8x256xf32>
    %cst_32 = arith.constant 0.000000e+00 : f32
    %62 = vector.shape_cast %34 : vector<1x256xi1> to vector<1x256xi1>
    %63 = vector.broadcast %62 : vector<1x256xi1> to vector<8x256xi1>
    %64 = vector.broadcast %cst_32 : f32 to vector<8x256xf32>
    %65 = arith.select %63, %61, %64 : vector<8x256xi1>, vector<8x256xf32>
    %c0_33 = arith.constant 0 : index
    %c144 = arith.constant 144 : index
    %66 = vector.load %arg7[%c0_33, %c144] : memref<8x401xf32, #tpu.memory_space<vmem>>, vector<8x256xf32>
    %c0_34 = arith.constant 0 : index
    %c145 = arith.constant 145 : index
    %67 = vector.load %arg7[%c0_34, %c145] : memref<8x401xf32, #tpu.memory_space<vmem>>, vector<8x256xf32>
    %cst_35 = arith.constant 0.000000e+00 : f32
    %68 = vector.shape_cast %36 : vector<1x256xi1> to vector<1x256xi1>
    %69 = vector.broadcast %68 : vector<1x256xi1> to vector<8x256xi1>
    %70 = vector.broadcast %cst_35 : f32 to vector<8x256xf32>
    %71 = arith.select %69, %67, %70 : vector<8x256xi1>, vector<8x256xf32>
    %72 = tpu.concatenate %43, %44, %49, %54, %55, %60, %65, %66, %71 in 0 : vector<8x256xf32>, vector<8x256xf32>, vector<8x256xf32>, vector<8x256xf32>, vector<8x256xf32>, vector<8x256xf32>, vector<8x256xf32>, vector<8x256xf32>, vector<8x256xf32> -> vector<72x256xf32>
    %cst_36 = arith.constant dense<0.000000e+00> : vector<8x256xf32>
    %73 = tpu.matmul %15, %72, %cst_36 {dimension_numbers = #tpu.dot_dimension_numbers<[1], [0], [0], [1], [0, 0, 1, 1], [], []>} : vector<8x72xf32>, vector<72x256xf32>, vector<8x256xf32> -> vector<8x256xf32>
    %c0_37 = arith.constant 0 : index
    %c0_38 = arith.constant 0 : index
    %c0_39 = arith.constant 0 : index
    %74 = vector.load %arg5[%c0_37, %c0_38, %c0_39] : memref<1x8x256xf32, #tpu.memory_space<vmem>>, vector<1x8x256xf32>
    %75 = vector.shape_cast %74 : vector<1x8x256xf32> to vector<8x256xf32>
    %76 = vector.shape_cast %73 : vector<8x256xf32> to vector<1x8x256xf32>
    tpu.vector_store %arg5[%c0_37, %c0_38, %c0_39], %76 {strides = array<i32>} : memref<1x8x256xf32, #tpu.memory_space<vmem>>, vector<1x8x256xf32>,
    %cst_40 = arith.constant dense<0.000000e+00> : vector<8xf32>
    %77 = vector.multi_reduction <add>, %73, %cst_40 [1] : vector<8x256xf32> to vector<8xf32>
    %78 = vector.shape_cast %77 : vector<8xf32> to vector<8x1xf32>
    %79 = arith.addf %37, %78 : vector<8x1xf32>
    %80 = arith.mulf %73, %73 : vector<8x256xf32>
    %cst_41 = arith.constant dense<0.000000e+00> : vector<8xf32>
    %81 = vector.multi_reduction <add>, %80, %cst_41 [1] : vector<8x256xf32> to vector<8xf32>
    %82 = vector.shape_cast %81 : vector<8xf32> to vector<8x1xf32>
    %83 = arith.addf %38, %82 : vector<8x1xf32>
    %84 = tpu.concatenate %79, %83 in 1 : vector<8x1xf32>, vector<8x1xf32> -> vector<8x2xf32>
    %c0_42 = arith.constant 0 : index
    %c0_43 = arith.constant 0 : index
    %c0_44 = arith.constant 0 : index
    %85 = vector.load %arg6[%c0_42, %c0_43, %c0_44] : memref<1x8x2xf32, #tpu.memory_space<vmem>>, vector<1x8x2xf32>
    %86 = vector.shape_cast %85 : vector<1x8x2xf32> to vector<8x2xf32>
    %87 = vector.shape_cast %84 : vector<8x2xf32> to vector<1x8x2xf32>
    tpu.vector_store %arg6[%c0_42, %c0_43, %c0_44], %87 {strides = array<i32>} : memref<1x8x2xf32, #tpu.memory_space<vmem>>, vector<1x8x2xf32>,
    return
  }
  func.func @transform_0(%arg0: i32) -> (i32, i32, i32) {
    %c0_i32 = arith.constant 0 : i32
    %c0_i32_0 = arith.constant 0 : i32
    %c0_i32_1 = arith.constant 0 : i32
    return %arg0, %c0_i32, %c0_i32_0 : i32, i32, i32
  }
  func.func @transform_1(%arg0: i32) -> (i32, i32) {
    %c0_i32 = arith.constant 0 : i32
    %c0_i32_0 = arith.constant 0 : i32
    %c0_i32_1 = arith.constant 0 : i32
    return %c0_i32, %c0_i32_0 : i32, i32
  }
  func.func @transform_2(%arg0: i32) -> (i32, i32) {
    %c0_i32 = arith.constant 0 : i32
    %c0_i32_0 = arith.constant 0 : i32
    %c0_i32_1 = arith.constant 0 : i32
    return %c0_i32, %c0_i32_0 : i32, i32
  }
  func.func @transform_3(%arg0: i32) -> (i32, i32) {
    %c0_i32 = arith.constant 0 : i32
    %c0_i32_0 = arith.constant 0 : i32
    %c0_i32_1 = arith.constant 0 : i32
    return %c0_i32, %c0_i32_0 : i32, i32
  }
  func.func @transform_4(%arg0: i32) -> (i32, i32, i32) {
    %c0_i32 = arith.constant 0 : i32
    %c0_i32_0 = arith.constant 0 : i32
    %c0_i32_1 = arith.constant 0 : i32
    return %arg0, %c0_i32, %c0_i32_0 : i32, i32, i32
  }
  func.func @transform_5(%arg0: i32) -> (i32, i32, i32) {
    %c0_i32 = arith.constant 0 : i32
    %c0_i32_0 = arith.constant 0 : i32
    %c0_i32_1 = arith.constant 0 : i32
    return %arg0, %c0_i32, %c0_i32_0 : i32, i32, i32
  }
}

</mosaic_0001>

<bundles_post_ra>
// kernel: double_conv.5
= control target key start
LH: loop header
LB: loop body
LE: loop exit
PB: predicated region body
PF: predicated region fallthrough
CT: control target
= control target key end

     0   :  { %s300_s12 = smov 0   ;;  %s323_s0 = inlined_call_operand.vmem [shape: f32[2,8,256], index: 0, kind: input, shape index: {}]   ;;  %s324_s1 = inlined_call_operand.vmem [shape: f32[8,1], index: 1, kind: input, shape index: {}]   ;;  %s325_s2 = inlined_call_operand.vmem [shape: f32[8,1], index: 2, kind: input, shape index: {}]   ;;  %s326_s3 = inlined_call_operand.vmem [shape: f32[2,8,256], index: 3, kind: output, shape index: {}]  }
   0x1 LB: > { %s248_s13 = sadd.s32 4294967295, %s277_s12   ;;  %p252_p0 = scmp.ge.s32.totalorder %s277_s12, 1  ;;  %s277_s12 = sphi %s300_s12, %s13_s12  }
   0x2   : > { %p137_p1 = scmp.lt.s32.totalorder %s277_s12, 3 }
   0x4   : > { %p138_p2 = pnand %p252_p0, %p137_p1 }
   0x5   : > { %v173_v0 = vld [vmem:[%s324_s1] sm:$0xff] (!%p138_p2)  ;;  %v279_v1 = vmov (!%p138_p2), 0   ;;  %p161_p3 = scmp.lt.s32.totalorder (!%p138_p2), %s248_s13, 1 }
   0x6   : > { %141 = sbr.rel (%p138_p2) target bundleno = 144 (0x90), region = 32  ;;  %270 = vset.pattern.permute.xlu0 (!%p138_p2), %v279_v1  ;;  %v181_v2 = vld [vmem:[%s325_s2] sm:$0xff] (!%p138_p2) }
   0x7   : > { %176 = vperm.xlu0 (!%p138_p2), %270, %v173_v0  }
   0xb   : > { %184 = vperm.xlu0 (!%p138_p2), %270, %v181_v2  }
   0xd   : > { %s328_s13 = smov (!%p161_p3, %s248_s13), 1 }
   0xe   : > { %s259_s18 = sshll.u32 %s328_s13, 4 }
   0xf   : > { %s165_s21 = scalar_lea.vmem %s323_s0, %s259_s18  ;;  %s170_s24 = scalar_lea.vmem %s326_s3, %s259_s18 }
  0x10   : > { %v171_v4 = vld [vmem:[%s165_s21] sm:$0xff]  ;;  %v172_v5 = vld [vmem:[%s165_s21 + $0x8] sm:$0xff] }
  0x86   : > { %v177_v3 = vpop.permute.xlu0 %176 }
  0x87   : > { %v179_v6 = vmul.f32 %v177_v3, %v171_v4  ;;  %v180_v7 = vmul.f32 %v177_v3, %v172_v5 }
  0x8a   : > { %v185_v8 = vpop.permute.xlu0 %184 }
  0x8b   : > { %v187_v9 = vadd.f32 %v185_v8, %v179_v6  ;;  %v188_v10 = vadd.f32 %v185_v8, %v180_v7 }
  0x8d   : > { %v189_v11 = vmax.f32 %v187_v9, 0.0  ;;  %v190_v12 = vmax.f32 %v188_v10, 0.0 }
  0x8f   : > { %191 = vst [vmem:[%s170_s24] sm:$0xff] %v189_v11  ;;  %192 = vst [vmem:[%s170_s24 + $0x8] sm:$0xff] %v190_v12 }
  0x90 PF: > { %s13_s12 = sadd.s32 1, %s277_s12  }
  0x91   : > { %p10_p4 = scmp.ge.s32.totalorder %s13_s12, 4  }
  0x93   :  { %12 = sbr.rel (!%p10_p4) target bundleno = 1 (0x1), region = 62 }

// kernel: double_conv.4
= control target key start
LH: loop header
LB: loop body
LE: loop exit
PB: predicated region body
PF: predicated region fallthrough
CT: control target
= control target key end

     0   :  { %s740_s18 = smov 0   ;;  %s857_s0 = inlined_call_operand.vmem [shape: f32[2,8,256], index: 0, kind: input, shape index: {}]   ;;  %s858_s1 = inlined_call_operand.vmem [shape: f32[8,72], index: 1, kind: input, shape index: {}]   ;;  %s859_s2 = inlined_call_operand.vmem [shape: f32[8,1], index: 2, kind: input, shape index: {}]   ;;  %s860_s3 = inlined_call_operand.vmem [shape: f32[8,1], index: 3, kind: input, shape index: {}]   ;;  %s861_s4 = inlined_call_operand.vmem [shape: f32[2,8,256], index: 4, kind: output, shape index: {0}]   ;;  %s862_s5 = inlined_call_operand.vmem [shape: f32[2,8,2], index: 5, kind: output, shape index: {1}]  }
   0x1 LB: > { %s585_s19 = sadd.s32 4294967295, %s697_s18   ;;  %p589_p0 = scmp.ge.s32.totalorder %s697_s18, 1  ;;  %s697_s18 = sphi %s740_s18, %s16_s18  }
   0x2   : > { %p190_p1 = scmp.lt.s32.totalorder %s697_s18, 3 }
   0x4   : > { %p191_p2 = pnand %p589_p0, %p190_p1 }
   0x5   : > { %v238_v0 = vld [vmem:[%s859_s2] sm:$0xff] (!%p191_p2)  ;;  %vm256_vm0 = vcmask (!%p191_p2), 1048440   ;;  %v699_v1 = vmov (!%p191_p2), 0   ;;  %v700_v2 = vmov (!%p191_p2), 0.0   ;;  %vm258_vm1 = vcmask (!%p191_p2), 138240   ;;  %s701_s24 = smov (!%p191_p2), 16  }
   0x6   : > { %194 = sbr.rel (%p191_p2) target bundleno = 649 (0x289), region = 36  ;;  %655 = vset.pattern.permute.xlu0 (!%p191_p2), %v699_v1  ;;  %257 = vst.msk [vmem:[#allocation2] sm:$0xff] (!%p191_p2), %vm256_vm0, %v700_v2  ;;  %477 = vmatprep.mubr.f32.mxu0 (!%p191_p2), %v700_v2  ;;  %v246_v3 = vld [vmem:[%s860_s3] sm:$0xff] (!%p191_p2)  ;;  %s702_s25 = smov (!%p191_p2), 17   ;;  %v263_v20 = vlaneseq (!%p191_p2)  ;;  %vm326_vm2 = vcmask (!%p191_p2), 121856   ;;  %vm393_vm4 = vcmask (!%p191_p2), 130048  }
   0x7   : > { %241 = vperm.xlu0 (!%p191_p2), %655, %v238_v0   ;;  %259 = vst.msk [vmem:[#allocation2 + $0x18] sm:$0xff] (!%p191_p2), %vm258_vm1, %v700_v2  ;;  %s703_s26 = smov (!%p191_p2), 1   ;;  %s704_s27 = smov (!%p191_p2), 15   ;;  %vm354_vm6 = vcmask (!%p191_p2), 1039360   ;;  %vm709_vm7 = vmmov (!%p191_p2), 1   ;;  %vm339_vm9 = vcmask (!%p191_p2), 7168  }
   0x8   : > { %p222_p3 = scmp.lt.s32.totalorder (!%p191_p2), %s585_s19, 1  ;;  %s705_s7 = smov (!%p191_p2), 127   ;;  %v264_v21 = vand.u32 (!%p191_p2), 127, %v263_v20  ;;  %vm367_vm0 = vcmask (!%p191_p2), 924672  }
   0x9   : > { %s706_s8 = smov (!%p191_p2), 113   ;;  %s707_s9 = smov (!%p191_p2), 111  }
   0xa   : > { %s708_s10 = smov (!%p191_p2), 112   ;;  %v265_v24 = vadd.s32 (!%p191_p2), 128, %v264_v21  ;;  %v270_v28 = vand.u32 (!%p191_p2), 15, %v264_v21 }
   0xb   : > { %249 = vperm.xlu0 (!%p191_p2), %655, %v246_v3  }
   0xc   : > { %v277_v27 = vand.u32 (!%p191_p2), 15, %v265_v24  ;;  %vm779_vm5 = vcmp.ne.s32.totalorder (!%p191_p2), %v270_v28, 0  ;;  %vm803_vm12 = vcmp.ne.s32.totalorder (!%p191_p2), %v270_v28, 15 }
   0xd   : > { %v294_v4 = vld [vmem:[#allocation2] sm:$0xff]  ;;  %s876_s19 = smov (!%p222_p3, %s585_s19), 1  ;;  %vm799_vm11 = vmpackc.low %vm709_vm7, %vm779_vm5 }
   0xe   : > { %387 = vrot.lane.b32.xlu1 %v294_v4, %s701_s24  ;;  %s610_s28 = sshll.u32 %s876_s19, 4  ;;  %v346_v16 = vld [vmem:[#allocation2 + $0x18] sm:$0xff]  ;;  %vm775_vm3 = vcmp.ne.s32.totalorder %v277_v27, 0  ;;  %vm792_vm10 = vcmp.ne.s32.totalorder %v277_v27, 15  ;;  %vm622_vm14 = vmpackc.low %vm779_vm5, %vm803_vm12  ;;  %s594_s16 = sshll.u32 %s876_s19, 3  ;;  %vm497_vm5 = vcmask 15360  }
   0xf   : > { %304 = vrot.lane.b32.xlu0 %v294_v4, %s702_s25  ;;  %s226_s6 = scalar_lea.vmem %s857_s0, %s610_s28  ;;  %vm788_vm8 = vmpackc.low %vm709_vm7, %vm775_vm3  ;;  %s231_s15 = scalar_lea.vmem %s861_s4, %s610_s28 }
  0x10   : > { %v236_v6 = vld [vmem:[%s226_s6] sm:$0xff]  ;;  %v237_v7 = vld [vmem:[%s226_s6 + $0x8] sm:$0xff]  ;;  %vm619_vm13 = vmpackc.low %vm775_vm3, %vm792_vm10  ;;  %vm380_vm3 = vcmask 908288   ;;  %s235_s21 = scalar_lea.vmem %s862_s5, %s594_s16 }
  0x11   : > { %vm625_vm15 = vmpackc.low %vm792_vm10, %vm709_vm7 }
  0x12   : > { %333 = vrot.lane.b32.xlu1 %v294_v4, %s703_s26 }
  0x13   : > { %320 = vrot.lane.b32.xlu0 %v294_v4, %s704_s27 }
  0x80   : > { %v388_v18 = vpop.permute.xlu1 %387 }
  0x84   : > { %v334_v22 = vpop.permute.xlu1 %333 }
  0x86   : > { %v242_v5 = vpop.permute.xlu0 %241 }
  0x87   : > { %v244_v8 = vmul.f32 %v242_v5, %v236_v6  ;;  %v245_v9 = vmul.f32 %v242_v5, %v237_v7 }
  0x8a   : > { %v250_v10 = vpop.permute.xlu0 %249 }
  0x8b   : > { %v252_v11 = vadd.f32 %v250_v10, %v244_v8  ;;  %v253_v12 = vadd.f32 %v250_v10, %v245_v9 }
  0x8d   : > { %v763_v13 = vmax.f32 %v252_v11, 0.0  ;;  %v765_v14 = vmax.f32 %v253_v12, 0.0 }
  0x8e   : > { %v305_v19 = vpop.permute.xlu0 %304 }
  0x8f   : > { %v666_v15 = vpack.i.bf16 %v765_v14, %v763_v13  ;;  %v676_v17 = vpack.i.bf16 %v346_v16, %v765_v14 }
  0x91   : > { %667 = vrot.lane.b32.xlu0 %v666_v15, %s704_s27  ;;  %657 = vrot.lane.b32.xlu1 %v666_v15, %s702_s25 }
  0x92   : > { %v321_v23 = vpop.permute.xlu0 %320 }
  0x95   : > { %677 = vrot.lane.b32.xlu0 %v676_v17, %s705_s7  ;;  %662 = vrot.lane.b32.xlu1 %v666_v15, %s701_s24 }
  0x99   : > { %682 = vrot.lane.b32.xlu0 %v676_v17, %s706_s8  ;;  %672 = vrot.lane.b32.xlu1 %v666_v15, %s703_s26 }
  0x9d   : > { %361 = vrot.lane.b32.xlu0 %v763_v13, %s706_s8  ;;  %348 = vrot.lane.b32.xlu1 %v763_v13, %s705_s7 }
  0xa1   : > { %376 = vrot.lane.b32.xlu0 %v765_v14, %s707_s9  ;;  %687 = vrot.lane.b32.xlu1 %v676_v17, %s708_s10 }
  0xa5   : > { %374 = vrot.lane.b32.xlu0 %v763_v13, %s707_s9  ;;  %398 = vrot.lane.b32.xlu1 %v763_v13, %s708_s10 }
  0xa9   : > { %378 = vrot.lane.b32.xlu1 %v346_v16, %s707_s9 }
 0x103   : > { %v668_v25 = vpop.permute.xlu0 %667  ;;  %v658_v26 = vpop.permute.xlu1 %657 }
 0x104   : > { %v660_v29 = vunpack.i.h.bf16 %v658_v26  ;;  %v659_v30 = vunpack.i.l.bf16 %v658_v26  ;;  %v670_v37 = vunpack.i.h.bf16 %v668_v25  ;;  %v669_v38 = vunpack.i.l.bf16 %v668_v25 }
 0x106   : > { %v311_v39 = vsel %vm258_vm1, %v659_v30, %v660_v29  ;;  %v310_v40 = vsel %vm258_vm1, %v305_v19, %v659_v30  ;;  %v327_v55 = vsel %vm326_vm2, %v321_v23, %v669_v38  ;;  %v328_v56 = vsel %vm326_vm2, %v669_v38, %v670_v37  ;;  %vm628_vm1 = vmpackc.low %vm803_vm12, %vm709_vm7  ;;  %v262_v19 = vld [vmem:[%s858_s1] sm:$0xff] }
 0x107   : > { %v678_v31 = vpop.permute.xlu0 %677  ;;  %v663_v32 = vpop.permute.xlu1 %662  ;;  %vm404_vm2 = vcmask 916480  }
 0x108   : > { %v665_v34 = vunpack.i.h.bf16 %v663_v32  ;;  %v664_v35 = vunpack.i.l.bf16 %v663_v32  ;;  %v680_v41 = vunpack.i.h.bf16 %v678_v31  ;;  %v679_v42 = vunpack.i.l.bf16 %v678_v31 }
 0x10a   : > { %v395_v43 = vsel %vm393_vm4, %v664_v35, %v665_v34  ;;  %v394_v45 = vsel %vm393_vm4, %v388_v18, %v664_v35  ;;  %v356_v59 = vsel %vm354_vm6, %v679_v42, %v680_v41  ;;  %vm409_vm4 = vcmask 588800  }
 0x10b   : > { %v683_v46 = vpop.permute.xlu0 %682  ;;  %v673_v47 = vpop.permute.xlu1 %672  ;;  %v612_v49 = vpack.c.bf16 %v395_v43, %v311_v39  ;;  %v615_v50 = vpack.c.bf16 %v394_v45, %v310_v40  ;;  %v624_v0 = vpack.c.bf16 %v356_v59, %v765_v14 }
 0x10c   : > { %v675_v52 = vunpack.i.h.bf16 %v673_v47  ;;  %v674_v53 = vunpack.i.l.bf16 %v673_v47  ;;  %v685_v2 = vunpack.i.h.bf16 %v683_v46  ;;  %v684_v3 = vunpack.i.l.bf16 %v683_v46 }
 0x10d   : > { %614 = vmatprep.subr.msk.bf16.mxu0 %vm788_vm8, %v612_v49 }
 0x10e   : > { %v340_v57 = vsel %vm339_vm9, %v334_v22, %v674_v53  ;;  %v341_v58 = vsel %vm339_vm9, %v674_v53, %v675_v52  ;;  %617 = vmatpush1.bf16.msk.msra.mxu0 %vm799_vm11, %v615_v50  ;;  %v369_v9 = vsel %vm367_vm0, %v684_v3, %v685_v2 }
 0x10f   : > { %v618_v60 = vpack.c.bf16 %v341_v58, %v328_v56  ;;  %v621_v61 = vpack.c.bf16 %v340_v57, %v327_v55  ;;  %v362_v62 = vpop.permute.xlu0 %361  ;;  %v349_v63 = vpop.permute.xlu1 %348 }
 0x110   : > { %v355_v1 = vsel %vm354_vm6, %v349_v63, %v679_v42  ;;  %v368_v14 = vsel %vm367_vm0, %v362_v62, %v684_v3 }
 0x111   : > { %620 = vmatprep.subr.msk.bf16.mxu0 %vm619_vm13, %v618_v60  ;;  %v627_v5 = vpack.c.bf16 %v355_v1, %v763_v13 }
 0x112   : > { %623 = vmatpush1.bf16.msk.msra.mxu0 %vm622_vm14, %v621_v61 }
 0x113   : > { %v688_v4 = vpop.permute.xlu1 %687  ;;  %626 = vmatprep.subr.msk.bf16.mxu0 %vm625_vm15, %v624_v0  ;;  %v377_v8 = vpop.permute.xlu0 %376 }
 0x114   : > { %v690_v6 = vunpack.i.h.bf16 %v688_v4  ;;  %v689_v7 = vunpack.i.l.bf16 %v688_v4 }
 0x116   : > { %629 = vmatpush1.bf16.msk.msra.mxu0 %vm628_vm1, %v627_v5  ;;  %v406_v10 = vsel %vm404_vm2, %v689_v7, %v690_v6 }
 0x117   : > { %v399_v11 = vpop.permute.xlu1 %398  ;;  %v630_v12 = vpack.c.bf16 %v406_v10, %v369_v9  ;;  %v375_v17 = vpop.permute.xlu0 %374 }
 0x118   : > { %v405_v15 = vsel %vm404_vm2, %v399_v11, %v689_v7  ;;  %v381_v20 = vsel %vm380_vm3, %v375_v17, %v377_v8 }
 0x119   : > { %v633_v16 = vpack.c.bf16 %v405_v15, %v368_v14  ;;  %632 = vmatprep.subr.msk.bf16.mxu0 %vm788_vm8, %v630_v12 }
 0x11b   : > { %v379_v18 = vpop.permute.xlu1 %378  ;;  %635 = vmatpush1.bf16.msk.msra.mxu0 %vm799_vm11, %v633_v16 }
 0x11c   : > { %v382_v13 = vsel %vm380_vm3, %v377_v8, %v379_v18 }
 0x11d   : > { %605 = vmatprep.subr.msk.mxu0 %vm792_vm10, %v382_v13 }
 0x11f   : > { %606 = vmatpush1.msk.msra.mxu0 %vm803_vm12, %v381_v20 }
 0x120   : > { %607 = vmatmul.mubr.msk.f32.vlgmr.msra.gmra.mrb[0].mxu0 %vm409_vm4, %v262_v19 }
 0x1f3   : > { %v479_v21 = vpop.f32.mrb[0].mxu0 }
 0x1f4   : > { %v481_v22 = vpop.f32.mrb[1].mxu0  ;;  %484 = vst [vmem:[%s231_s15] sm:$0xff] %v479_v21  ;;  %v490_v23 = vmul.f32 %v479_v21, %v479_v21 }
 0x1f5   : > { %485 = vst [vmem:[%s231_s15 + $0x8] sm:$0xff] %v481_v22  ;;  %v491_v24 = vmul.f32 %v481_v22, %v481_v22  ;;  %v486_v25 = vadd.f32 %v481_v22, %v479_v21 }
 0x1f7   : > { %487 = vadd.xlane.f32.xlu1 %v486_v25  ;;  %v492_v26 = vadd.f32 %v491_v24, %v490_v23 }
 0x1f9   : > { %493 = vadd.xlane.f32.xlu0 %v492_v26 }
 0x284   : > { %v488_v27 = vpop.xlane.xlu1 %487 }
 0x286   : > { %v494_v28 = vpop.xlane.xlu0 %493 }
 0x287   : > { %v496_v29 = vsel %vm339_vm9, %v488_v27, %v494_v28 }
 0x288   : > { %498 = vst.msk [vmem:[%s235_s21] sm:$0xff] %vm497_vm5, %v496_v29 }
 0x289 PF: > { %s16_s18 = sadd.s32 1, %s697_s18  }
 0x28a   : > { %p13_p4 = scmp.ge.s32.totalorder %s16_s18, 4  }
 0x28c   :  { %15 = sbr.rel (!%p13_p4) target bundleno = 1 (0x1), region = 78 }

// kernel: double_conv.3
= control target key start
LH: loop header
LB: loop body
LE: loop exit
PB: predicated region body
PF: predicated region fallthrough
CT: control target
= control target key end

     0   :  { %s727_s18 = smov 0   ;;  %s836_s0 = inlined_call_operand.vmem [shape: f32[2,4,256], index: 0, kind: input, shape index: {}]   ;;  %s837_s1 = inlined_call_operand.vmem [shape: f32[8,36], index: 1, kind: input, shape index: {}]   ;;  %s838_s2 = inlined_call_operand.vmem [shape: f32[4,1], index: 2, kind: input, shape index: {}]   ;;  %s839_s3 = inlined_call_operand.vmem [shape: f32[4,1], index: 3, kind: input, shape index: {}]   ;;  %s840_s4 = inlined_call_operand.vmem [shape: f32[2,8,256], index: 4, kind: output, shape index: {0}]   ;;  %s841_s5 = inlined_call_operand.vmem [shape: f32[2,8,2], index: 5, kind: output, shape index: {1}]  }
   0x1 LB: > { %s600_s2 = sadd.s32 4294967295, %s686_s18   ;;  %p604_p0 = scmp.ge.s32.totalorder %s686_s18, 1  ;;  %s686_s18 = sphi %s727_s18, %s16_s18  }
   0x2   : > { %p190_p1 = scmp.lt.s32.totalorder %s686_s18, 3 }
   0x4   : > { %p191_p2 = pnand %p604_p0, %p190_p1 }
   0x5   : > { %p222_p3 = scmp.lt.s32.totalorder (!%p191_p2), %s600_s2, 1  ;;  %vm237_vm0 = vcmask (!%p191_p2), 1044344   ;;  %vm239_vm1 = vcmask (!%p191_p2), 134144   ;;  %v688_v0 = vmov (!%p191_p2), 0.0   ;;  %s689_s22 = smov (!%p191_p2), 15   ;;  %v243_v15 = vlaneseq (!%p191_p2) }
   0x6   : > { %194 = sbr.rel (%p191_p2) target bundleno = 537 (0x219), region = 36  ;;  %238 = vst.msk [vmem:[#allocation2] sm:$0xf] (!%p191_p2), %vm237_vm0, %v688_v0  ;;  %492 = vmatprep.mubr.f32.mxu0 (!%p191_p2), %v688_v0  ;;  %s690_s23 = smov (!%p191_p2), 1   ;;  %vm319_vm2 = vcmask (!%p191_p2), 7168   ;;  %vm289_vm4 = vcmask (!%p191_p2), 138240  }
   0x7   : > { %240 = vst.msk [vmem:[#allocation2 + $0xc] sm:$0xf] (!%p191_p2), %vm239_vm1, %v688_v0  ;;  %s691_s24 = smov (!%p191_p2), 127   ;;  %s692_s25 = smov (!%p191_p2), 17   ;;  %v244_v16 = vand.u32 (!%p191_p2), 127, %v243_v15  ;;  %vm378_vm6 = vcmask (!%p191_p2), 130048  }
   0x8   : > { %s693_s26 = smov (!%p191_p2), 16   ;;  %s694_s27 = smov (!%p191_p2), 113   ;;  %vm306_vm8 = vcmask (!%p191_p2), 121856   ;;  %vm409_vm9 = vcmask (!%p191_p2), 1043456   ;;  %vm337_vm11 = vcmask (!%p191_p2), 1039360   ;;  %vm350_vm12 = vcmask (!%p191_p2), 924672  }
   0x9   : > { %s695_s28 = smov (!%p191_p2), 112   ;;  %s696_s29 = smov (!%p191_p2), 111   ;;  %v245_v19 = vadd.s32 (!%p191_p2), 128, %v244_v16  ;;  %v250_v23 = vand.u32 (!%p191_p2), 15, %v244_v16  ;;  %vm404_vm13 = vcmask (!%p191_p2), 916480   ;;  %vm363_vm14 = vcmask (!%p191_p2), 908288  }
   0xa   : > { %vm418_vm15 = vcmask (!%p191_p2), 293888   ;;  %vm512_vm0 = vcmask (!%p191_p2), 15360  }
   0xb   : > { %v257_v22 = vand.u32 (!%p191_p2), 15, %v245_v19  ;;  %vm762_vm5 = vcmp.ne.s32.totalorder (!%p191_p2), %v250_v23, 0  ;;  %vm776_vm10 = vcmp.ne.s32.totalorder (!%p191_p2), %v250_v23, 15 }
   0xd   : > { %s851_s2 = smov (!%p222_p3, %s600_s2), 1  ;;  %vm758_vm3 = vcmp.ne.s32.totalorder %v257_v22, 0  ;;  %vm766_vm7 = vcmp.ne.s32.totalorder %v257_v22, 15 }
   0xe   : > { %s615_s3 = sshll.u32 %s851_s2, 3  ;;  %v327_v9 = vld [vmem:[#allocation2 + $0xc] sm:$0xf]  ;;  %s616_s7 = sshll.u32 %s851_s2, 4 }
   0xf   : > { %s226_s21 = scalar_lea.vmem %s836_s0, %s615_s3  ;;  %v397_v12 = vcombine.low %v327_v9, %v327_v9  ;;  %s231_s10 = scalar_lea.vmem %s840_s4, %s616_s7 }
  0x10   : > { %v743_v1 = vld [vmem:[%s226_s21] sm:$0xff]  ;;  %s235_s13 = scalar_lea.vmem %s841_s5, %s615_s3 }
  0x11   : > { %241 = vst [vmem:[#allocation2 + $0x4] sm:$0xff] %v743_v1  ;;  %v749_v8 = vcombine.high %v743_v1, %v743_v1  ;;  %v672_v13 = vpack.i.bf16 %v397_v12, %v743_v1  ;;  %v396_v14 = vcombine.low %v743_v1, %v743_v1 }
  0x13   : > { %v662_v10 = vpack.i.bf16 %v327_v9, %v749_v8 }
  0x18   : > { %v274_v2 = vld [vmem:[#allocation2] sm:$0xff]  ;;  %v275_v4 = vld [vmem:[#allocation2 + $0x8] sm:$0xf] }
  0x19   : > { %300 = vrot.lane.b32.xlu1 %v274_v2, %s689_s22  ;;  %313 = vrot.lane.b32.xlu0 %v274_v2, %s690_s23  ;;  %v282_v3 = vcombine.high %v274_v2, %v274_v2  ;;  %v371_v6 = vcombine.low %v275_v4, %v275_v4  ;;  %v370_v11 = vcombine.low %v274_v2, %v274_v2 }
  0x1b   : > { %v647_v5 = vpack.i.bf16 %v275_v4, %v282_v3  ;;  %v657_v7 = vpack.i.bf16 %v371_v6, %v274_v2 }
  0x1d   : > { %331 = vrot.lane.b32.xlu1 %v743_v1, %s691_s24  ;;  %283 = vrot.lane.b32.xlu0 %v274_v2, %s692_s25 }
  0x21   : > { %648 = vrot.lane.b32.xlu1 %v647_v5, %s692_s25  ;;  %643 = vrot.lane.b32.xlu0 %v647_v5, %s690_s23 }
  0x25   : > { %653 = vrot.lane.b32.xlu1 %v647_v5, %s689_s22  ;;  %658 = vrot.lane.b32.xlu0 %v657_v7, %s693_s26 }
  0x29   : > { %663 = vrot.lane.b32.xlu1 %v662_v10, %s691_s24  ;;  %372 = vrot.lane.b32.xlu0 %v370_v11, %s693_s26 }
  0x2d   : > { %668 = vrot.lane.b32.xlu0 %v662_v10, %s694_s27  ;;  %344 = vrot.lane.b32.xlu1 %v743_v1, %s694_s27 }
  0x31   : > { %673 = vrot.lane.b32.xlu0 %v672_v13, %s695_s28  ;;  %398 = vrot.lane.b32.xlu1 %v396_v14, %s695_s28 }
  0x35   : > { %359 = vrot.lane.b32.xlu0 %v749_v8, %s696_s29  ;;  %361 = vrot.lane.b32.xlu1 %v327_v9, %s696_s29 }
  0x39   : > { %357 = vrot.lane.b32.xlu0 %v743_v1, %s696_s29 }
  0x8b   : > { %v301_v17 = vpop.permute.xlu1 %300  ;;  %v314_v18 = vpop.permute.xlu0 %313 }
  0x8f   : > { %v332_v20 = vpop.permute.xlu1 %331  ;;  %v284_v21 = vpop.permute.xlu0 %283 }
  0x93   : > { %v649_v24 = vpop.permute.xlu1 %648  ;;  %v644_v25 = vpop.permute.xlu0 %643 }
  0x94   : > { %v651_v28 = vunpack.i.h.bf16 %v649_v24  ;;  %v650_v29 = vunpack.i.l.bf16 %v649_v24  ;;  %v646_v30 = vunpack.i.h.bf16 %v644_v25  ;;  %v645_v31 = vunpack.i.l.bf16 %v644_v25 }
  0x96   : > { %v320_v33 = vsel %vm319_vm2, %v314_v18, %v645_v31  ;;  %v321_v34 = vsel %vm319_vm2, %v645_v31, %v646_v30  ;;  %v291_v35 = vsel %vm289_vm4, %v650_v29, %v651_v28  ;;  %v290_v36 = vsel %vm289_vm4, %v284_v21, %v650_v29 }
  0x97   : > { %v654_v37 = vpop.permute.xlu1 %653  ;;  %v659_v38 = vpop.permute.xlu0 %658  ;;  %v295_v39 = vsel %vm758_vm3, %v291_v35, 0.0  ;;  %v325_v40 = vsel %vm758_vm3, %v321_v34, 0.0  ;;  %v324_v42 = vsel %vm762_vm5, %v320_v33, 0.0  ;;  %v294_v47 = vsel %vm762_vm5, %v290_v36, 0.0 }
  0x98   : > { %v656_v43 = vunpack.i.h.bf16 %v654_v37  ;;  %v655_v44 = vunpack.i.l.bf16 %v654_v37  ;;  %v661_v45 = vunpack.i.h.bf16 %v659_v38  ;;  %v660_v46 = vunpack.i.l.bf16 %v659_v38 }
  0x99   : > { %v386_v50 = vrot.slane %v325_v40, 4  ;;  %v385_v57 = vrot.slane %v324_v42, 4 }
  0x9a   : > { %v308_v48 = vsel %vm306_vm8, %v655_v44, %v656_v43  ;;  %v380_v49 = vsel %vm378_vm6, %v660_v46, %v661_v45  ;;  %v307_v51 = vsel %vm306_vm8, %v301_v17, %v655_v44 }
  0x9b   : > { %v664_v52 = vpop.permute.xlu1 %663  ;;  %v373_v53 = vpop.permute.xlu0 %372  ;;  %v312_v54 = vsel %vm766_vm7, %v308_v48, 0.0  ;;  %v411_v55 = vsel %vm409_vm9, %v295_v39, %v380_v49  ;;  %v311_v56 = vsel %vm776_vm10, %v307_v51, 0.0 }
  0x9c   : > { %v666_v58 = vunpack.i.h.bf16 %v664_v52  ;;  %v665_v59 = vunpack.i.l.bf16 %v664_v52  ;;  %v379_v60 = vsel %vm378_vm6, %v373_v53, %v660_v46  ;;  %v413_v61 = vsel %vm409_vm9, %v312_v54, %v386_v50 }
  0x9d   : > { %v617_v62 = vpack.c.bf16 %v413_v61, %v411_v55  ;;  %v410_v63 = vsel %vm409_vm9, %v294_v47, %v379_v60  ;;  %v412_v0 = vsel %vm409_vm9, %v311_v56, %v385_v57 }
  0x9e   : > { %v338_v2 = vsel %vm337_vm11, %v332_v20, %v665_v59  ;;  %v339_v3 = vsel %vm337_vm11, %v665_v59, %v666_v58  ;;  %v619_v4 = vpack.c.bf16 %v412_v0, %v410_v63 }
  0x9f   : > { %v669_v5 = vpop.permute.xlu0 %668  ;;  %618 = vmatprep.subr.bf16.mxu0 %v617_v62  ;;  %v345_v6 = vpop.permute.xlu1 %344  ;;  %v343_v10 = vsel %vm766_vm7, %v339_v3, 0.0  ;;  %v342_v11 = vsel %vm776_vm10, %v338_v2, 0.0 }
  0xa0   : > { %v671_v7 = vunpack.i.h.bf16 %v669_v5  ;;  %v670_v9 = vunpack.i.l.bf16 %v669_v5  ;;  %620 = vmatpush1.bf16.msra.mxu0 %v619_v4  ;;  %v393_v12 = vrot.slane %v343_v10, 4  ;;  %v392_v17 = vrot.slane %v342_v11, 4 }
  0xa2   : > { %v351_v13 = vsel %vm350_vm12, %v345_v6, %v670_v9  ;;  %v352_v14 = vsel %vm350_vm12, %v670_v9, %v671_v7  ;;  %v415_v29 = vsel %vm409_vm9, %v749_v8, %v393_v12  ;;  %v414_v31 = vsel %vm409_vm9, %v743_v1, %v392_v17  ;;  %v242_v1 = vld [vmem:[%s837_s1] sm:$0xff] }
  0xa3   : > { %v674_v15 = vpop.permute.xlu0 %673  ;;  %v399_v16 = vpop.permute.xlu1 %398  ;;  %v355_v20 = vsel %vm762_vm5, %v351_v13, 0.0  ;;  %v356_v23 = vsel %vm758_vm3, %v352_v14, 0.0 }
  0xa4   : > { %v676_v18 = vunpack.i.h.bf16 %v674_v15  ;;  %v675_v19 = vunpack.i.l.bf16 %v674_v15 }
  0xa6   : > { %v405_v21 = vsel %vm404_vm13, %v399_v16, %v675_v19  ;;  %v406_v22 = vsel %vm404_vm13, %v675_v19, %v676_v18 }
  0xa7   : > { %v416_v24 = vsel %vm409_vm9, %v355_v20, %v405_v21  ;;  %v360_v25 = vpop.permute.xlu0 %359  ;;  %v362_v28 = vpop.permute.xlu1 %361  ;;  %v417_v30 = vsel %vm409_vm9, %v356_v23, %v406_v22 }
  0xa8   : > { %v365_v27 = vsel %vm363_vm14, %v360_v25, %v362_v28  ;;  %v621_v33 = vpack.c.bf16 %v417_v30, %v415_v29  ;;  %v623_v34 = vpack.c.bf16 %v416_v24, %v414_v31 }
  0xa9   : > { %v369_v26 = vsel %vm766_vm7, %v365_v27, 0.0 }
  0xaa   : > { %622 = vmatprep.subr.bf16.mxu0 %v621_v33 }
  0xab   : > { %v358_v35 = vpop.permute.xlu0 %357  ;;  %624 = vmatpush1.bf16.msra.mxu0 %v623_v34 }
  0xac   : > { %v364_v36 = vsel %vm363_vm14, %v358_v35, %v360_v25  ;;  %610 = vmatprep.subr.msk.mxu0 %vm409_vm9, %v369_v26 }
  0xad   : > { %v368_v8 = vsel %vm776_vm10, %v364_v36, 0.0 }
  0xaf   : > { %611 = vmatpush1.msk.msra.mxu0 %vm409_vm9, %v368_v8 }
  0xb0   : > { %612 = vmatmul.mubr.msk.f32.vlgmr.msra.gmra.mrb[0].mxu0 %vm418_vm15, %v242_v1 }
 0x183   : > { %v494_v32 = vpop.f32.mrb[0].mxu0 }
 0x184   : > { %v496_v37 = vpop.f32.mrb[1].mxu0  ;;  %499 = vst [vmem:[%s231_s10] sm:$0xff] %v494_v32  ;;  %v505_v38 = vmul.f32 %v494_v32, %v494_v32 }
 0x185   : > { %500 = vst [vmem:[%s231_s10 + $0x8] sm:$0xff] %v496_v37  ;;  %v506_v39 = vmul.f32 %v496_v37, %v496_v37  ;;  %v501_v40 = vadd.f32 %v496_v37, %v494_v32 }
 0x187   : > { %502 = vadd.xlane.f32.xlu1 %v501_v40  ;;  %v507_v41 = vadd.f32 %v506_v39, %v505_v38 }
 0x189   : > { %508 = vadd.xlane.f32.xlu0 %v507_v41 }
 0x214   : > { %v503_v42 = vpop.xlane.xlu1 %502 }
 0x216   : > { %v509_v43 = vpop.xlane.xlu0 %508 }
 0x217   : > { %v511_v44 = vsel %vm319_vm2, %v503_v42, %v509_v43 }
 0x218   : > { %513 = vst.msk [vmem:[%s235_s13] sm:$0xff] %vm512_vm0, %v511_v44 }
 0x219 PF: > { %s16_s18 = sadd.s32 1, %s686_s18  }
 0x21a   : > { %p13_p4 = scmp.ge.s32.totalorder %s16_s18, 4  }
 0x21c   :  { %15 = sbr.rel (!%p13_p4) target bundleno = 1 (0x1), region = 78 }

</bundles_post_ra>
